<compile_context>
chip_gen: v6e
topology: v6e:2x2x1
jax: 0.10.0
libtpu: 0.0.40
codegen_flags: <defaults>
</compile_context>

<pallas_src>
import math

import jax
import jax.numpy as jnp
from jax.experimental import pallas as pl
from jax.experimental.pallas import tpu as pltpu


def _round_up(x, m):
    return pl.cdiv(x, m) * m


def _siren_kernel(x_ref, wt_ref, b_ref, o_ref):
    # x_ref:  (TM, K)      VMEM (tile of rows)
    # wt_ref: (K, N_pad)   VMEM (w0 already folded in; resident across grid)
    # b_ref:  (1, N_pad)   VMEM (w0 already folded in; resident across grid)
    # o_ref:  (TM, N_pad)  VMEM
    acc = jnp.dot(x_ref[...], wt_ref[...], preferred_element_type=jnp.float32)
    o_ref[...] = jnp.sin(acc + b_ref[...]).astype(o_ref.dtype)


def prep_siren_params(weight, bias, w0=1.0):
    """One-time parameter prep: fold w0, transpose to (K, N), pad N to 128.

    weight: (dim_out, dim_in) as in the PyTorch module, bias: (dim_out,) or None.
    Returns (wt, b, dim_out) with wt: (dim_in, n_pad), b: (1, n_pad), f32.
    """
    dim_out, dim_in = weight.shape
    n_pad = int(_round_up(dim_out, 128))
    wt = jnp.zeros((dim_in, n_pad), jnp.float32)
    wt = wt.at[:, :dim_out].set((w0 * weight.astype(jnp.float32)).T)
    b = jnp.zeros((1, n_pad), jnp.float32)
    if bias is not None:
        b = b.at[:, :dim_out].set(w0 * bias.astype(jnp.float32))
    return wt, b, dim_out


def _pick_block_m(m, k, n_pad, budget_bytes=24 * 1024 * 1024):
    # Double-buffered x tile + out tile per row of the block, f32.
    per_row = 4 * 2 * (k + n_pad)
    tm = max(8, min(1024, budget_bytes // max(per_row, 1)))
    tm = (tm // 8) * 8
    tm = min(tm, int(_round_up(m, 8)))
    return max(tm, 8)


def siren_forward(x, wt, b, dim_out, block_m=None):
    """out = sin(x @ wt + b)[:, :dim_out] with wt/b from prep_siren_params."""
    M, K = x.shape
    Kw, n_pad = wt.shape
    assert K == Kw

    if block_m is None:
        block_m = _pick_block_m(M, K, n_pad)
    block_m = max(8, (block_m // 8) * 8)

    m_pad = int(_round_up(M, block_m))
    if m_pad != M:
        x = jnp.pad(x, ((0, m_pad - M), (0, 0)))
    grid_m = m_pad // block_m

    # 2x double-buffered x/out tiles + (conservatively 2x) resident weight/bias.
    need = 4 * (2 * block_m * K + 2 * block_m * n_pad + 2 * (K * n_pad + n_pad))
    vmem_limit_bytes = int(min(max(2 * need, 32 * 1024 * 1024), 48 * 1024 * 1024))

    # TODO(synk): for the classic first Siren layer (K=2 or 3) a broadcasted VPU
    # multiply-add would avoid a ~1% utilized MXU matmul; MXU path kept here.
    out = pl.pallas_call(
        _siren_kernel,
        out_shape=jax.ShapeDtypeStruct((m_pad, n_pad), x.dtype),
        grid_spec=pltpu.PrefetchScalarGridSpec(
            num_scalar_prefetch=0,
            grid=(grid_m,),
            in_specs=[
                pl.BlockSpec((block_m, K), lambda i: (i, 0)),
                pl.BlockSpec((K, n_pad), lambda i: (0, 0)),   # weight: resident
                pl.BlockSpec((1, n_pad), lambda i: (0, 0)),   # bias: resident
            ],
            out_specs=pl.BlockSpec((block_m, n_pad), lambda i: (i, 0)),
        ),
        compiler_params=pltpu.CompilerParams(
            dimension_semantics=("parallel",),
            vmem_limit_bytes=vmem_limit_bytes,
        ),
        cost_estimate=pl.CostEstimate(
            flops=2 * m_pad * n_pad * K,
            transcendentals=m_pad * n_pad,
            bytes_accessed=4 * (m_pad * K + K * n_pad + m_pad * n_pad),
        ),
    )(x, wt, b)

    return out[:M, :dim_out]


def init_siren_params(key, dim_in, dim_out, w0=1.0, c=6.0, is_first=False):
    """Deterministic re-implementation of Siren.init_ (uniform in [-w_std, w_std])."""
    w_std = (1.0 / dim_in) if is_first else (math.sqrt(c / dim_in) / w0)
    kw, kb = jax.random.split(key)
    weight = jax.random.uniform(
        kw, (dim_out, dim_in), dtype=jnp.float32, minval=-w_std, maxval=w_std
    )
    bias = jax.random.uniform(
        kb, (dim_out,), dtype=jnp.float32, minval=-w_std, maxval=w_std
    )
    return weight, bias


if __name__ == "__main__":
    key = jax.random.PRNGKey(0)
    k_x, k_p = jax.random.split(key)

    batch, dim_in, dim_out = 256, 32, 64
    w0 = 30.0

    x = jax.random.normal(k_x, (batch, dim_in), dtype=jnp.float32)
    weight, bias = init_siren_params(k_p, dim_in, dim_out, w0=w0, c=6.0, is_first=False)

    # One-time parameter prep (transpose, w0 fold, lane padding).
    wt, b, n_out = prep_siren_params(weight, bias, w0=w0)

    # block_m=64 forces a 4-step grid at this small demo size to exercise the
    # tiled/pipelined path; the default auto-picks a larger resident tile.
    out = siren_forward(x, wt, b, n_out, block_m=64)
    out = jax.block_until_ready(out)

    # Pure-JAX reference (matches the PyTorch forward).
    ref = jnp.sin(w0 * (x @ weight.T + bias[None, :]))
    assert out.shape == (batch, dim_out)
    assert jnp.allclose(out, ref, atol=1e-4, rtol=1e-4), float(
        jnp.max(jnp.abs(out - ref))
    )

    print("KERNEL_OK")
</pallas_src>

<mosaic_0001>
module attributes {stable_mosaic.version = 11 : i64} {
  func.func @_siren_kernel(%arg0: i32, %arg1: memref<64x32xf32, #tpu.memory_space<vmem>>, %arg2: memref<32x128xf32, #tpu.memory_space<vmem>>, %arg3: memref<1x128xf32, #tpu.memory_space<vmem>>, %arg4: memref<64x128xf32, #tpu.memory_space<vmem>>) attributes {dimension_semantics = [#tpu.dimension_semantics<parallel>], iteration_bounds = array<i64: 4>, scalar_prefetch = 0 : i64, scratch_operands = 0 : i64, tpu.core_type = #tpu.core_type<tc>, window_params = [{transform_indices = @transform_0, window_bounds = array<i64: 64, 32>}, {pipeline_mode = #tpu.pipeline_mode<synchronous>, transform_indices = @transform_1, window_bounds = array<i64: 32, 128>}, {pipeline_mode = #tpu.pipeline_mode<synchronous>, transform_indices = @transform_2, window_bounds = array<i64: 1, 128>}, {transform_indices = @transform_3, window_bounds = array<i64: 64, 128>}]} {
    %c0 = arith.constant 0 : index
    %c0_0 = arith.constant 0 : index
    %0 = vector.load %arg1[%c0, %c0_0] : memref<64x32xf32, #tpu.memory_space<vmem>>, vector<64x32xf32>
    %c0_1 = arith.constant 0 : index
    %c0_2 = arith.constant 0 : index
    %1 = vector.load %arg2[%c0_1, %c0_2] : memref<32x128xf32, #tpu.memory_space<vmem>>, vector<32x128xf32>
    %cst = arith.constant dense<0.000000e+00> : vector<64x128xf32>
    %2 = tpu.matmul %0, %1, %cst {dimension_numbers = #tpu.dot_dimension_numbers<[1], [0], [0], [1], [0, 0, 1, 1], [], []>} : vector<64x32xf32>, vector<32x128xf32>, vector<64x128xf32> -> vector<64x128xf32>
    %c0_3 = arith.constant 0 : index
    %c0_4 = arith.constant 0 : index
    %3 = vector.load %arg3[%c0_3, %c0_4] : memref<1x128xf32, #tpu.memory_space<vmem>>, vector<1x128xf32>
    %4 = vector.broadcast %3 : vector<1x128xf32> to vector<64x128xf32>
    %5 = arith.addf %2, %4 : vector<64x128xf32>
    %6 = math.sin %5 : vector<64x128xf32>
    %c0_5 = arith.constant 0 : index
    %c0_6 = arith.constant 0 : index
    %7 = vector.load %arg4[%c0_5, %c0_6] : memref<64x128xf32, #tpu.memory_space<vmem>>, vector<64x128xf32>
    tpu.vector_store %arg4[%c0_5, %c0_6], %6 {strides = array<i32>} : memref<64x128xf32, #tpu.memory_space<vmem>>, vector<64x128xf32>,
    return
  }
  func.func @transform_0(%arg0: i32) -> (i32, i32) {
    %c0_i32 = arith.constant 0 : i32
    %c0_i32_0 = arith.constant 0 : i32
    return %arg0, %c0_i32 : i32, i32
  }
  func.func @transform_1(%arg0: i32) -> (i32, i32) {
    %c0_i32 = arith.constant 0 : i32
    %c0_i32_0 = arith.constant 0 : i32
    %c0_i32_1 = arith.constant 0 : i32
    return %c0_i32, %c0_i32_0 : i32, i32
  }
  func.func @transform_2(%arg0: i32) -> (i32, i32) {
    %c0_i32 = arith.constant 0 : i32
    %c0_i32_0 = arith.constant 0 : i32
    %c0_i32_1 = arith.constant 0 : i32
    return %c0_i32, %c0_i32_0 : i32, i32
  }
  func.func @transform_3(%arg0: i32) -> (i32, i32) {
    %c0_i32 = arith.constant 0 : i32
    %c0_i32_0 = arith.constant 0 : i32
    return %arg0, %c0_i32 : i32, i32
  }
}

</mosaic_0001>

<bundles_post_ra>
// kernel: tpu_custom_call.1
= control target key start
LH: loop header
LB: loop body
LE: loop exit
PB: predicated region body
PF: predicated region fallthrough
CT: control target
= control target key end

     0   :  { %8 = vsyncpa [#allocation3], 0  ;;  %s2222_s0 = inlined_call_operand.vmem [shape: f32[256,32], index: 0, kind: input, shape index: {}]   ;;  %s2223_s1 = inlined_call_operand.vmem [shape: f32[32,128], index: 1, kind: input, shape index: {}]   ;;  %s2224_s2 = inlined_call_operand.vmem [shape: f32[1,128], index: 2, kind: input, shape index: {}]   ;;  %s2225_s3 = inlined_call_operand.hbm [shape: f32[256,128], index: 3, kind: output, shape index: {}]  }
   0x1   :  { %10 = vsyncpa [#allocation3 + $0x1], 0  ;;  %s1534_s12 = smov 0   ;;  %s1536_s13 = smov 0  }
   0x2   :  { %s1538_s14 = smov 0   ;;  %s1540_s15 = smov 0  }
   0x3 LB: > { %s1555_s16 = sadd.s32 4294967295, %s1503_s15   ;;  %s1237_s17 = sadd.s32 4294967294, %s1503_s15   ;;  %s1503_s15 = sphi %s1540_s15, %s2243_s15   ;;  %s1499_s14 = sphi %s1538_s14, %s2242_s14   ;;  %s1495_s13 = sphi %s1536_s13, %s2241_s13   ;;  %s1491_s12 = sphi %s1534_s12, %s2240_s12  }
   0x4   : > { %s1559_s18 = sadd.s32 1, %s1503_s15   ;;  %s91_s19 = sadd.s32 1, %s1499_s14 }
   0x5   : > { %s88_s20 = ssub.s32 %s1503_s15, %s1559_s18  ;;  %p101_p0 = scmp.ne.s32.totalorder %s1499_s14, %s1495_s13 }
   0x6   : > { %p89_p1 = scmp.eq.s32.totalorder %s88_s20, 0  ;;  %p102_p2 = scmp.eq.s32.totalorder %s1555_s16, 3 }
   0x7   : > { %p107_p3 = scmp.ne.s32.totalorder %s1495_s13, %s1491_s12  ;;  %p108_p4 = scmp.eq.s32.totalorder %s1237_s17, 3 }
   0x8   : > { %s1570_s21 = scalar_select %p89_p1, %s1499_s14, %s91_s19  }
   0x9   : > { %p1572_p5 = por %p102_p2, %p101_p0  ;;  %p1576_p6 = por %p108_p4, %p107_p3 }
   0xa   : > { %p1240_p7 = scmp.ge.s32.totalorder %s1503_s15, 1  ;;  %p141_p8 = scmp.lt.s32.totalorder %s1503_s15, 5 }
   0xc   : > { %p142_p9 = pnand %p1240_p7, %p141_p8 }
   0xd   : > { %s1242_s28 = sshll.u32 (!%p142_p9), %s1555_s16, 3  ;;  %s162_s17 = sand.u32 (!%p142_p9), 1, %s1495_s13  }
   0xe   : > { %145 = sbr.rel (%p142_p9) target bundleno = 475 (0x1db), region = 32  ;;  %p166_p10 = scmp.lt.s32.totalorder (!%p142_p9), %s1242_s28, 31 }
   0xf   : > { %s1241_s19 = sshll.u32 (!%p142_p9), %s162_s17, 6  ;;  %s1290_s26 = sshll.u32 (!%p142_p9), %s1555_s16, 10 }
  0x10   : > { %s1915_s20 = scalar_lea.vmem (!%p142_p9), [#allocation2], %s1241_s19  ;;  %s2174_s30 = scalar_lea.hbm (!%p142_p9), %s2225_s3, %s1290_s26 }
  0x11   : > { %s1175_s27 = sshll.u32 (!%p142_p9), %s1915_s20, 4  ;;  %s2182_s16 = scalar_lea.sflag (!%p142_p9), [#allocation3], %s162_s17  ;;  %s2176_s27 = int_to_ptr.vmem [resolvable:$true] %s1175_s27 }
  0x12   : > { %s1443_s4 = scalar_lea.vmem (!%p142_p9), %s2176_s27, 1024  ;;  %s1511_s5 = smov (!%p142_p9), [#allocation2]  }
  0x13   : > { %v183_v0 = vld [vmem:[%s2223_s1 + $0x18] sm:$0xff]  ;;  %v182_v1 = vld [vmem:[%s2223_s1 + $0x10] sm:$0xff]  ;;  %v181_v2 = vld [vmem:[%s2223_s1 + $0x8] sm:$0xff]  ;;  %s2245_s28 = smov (!%p166_p10, %s1242_s28), 31  ;;  %vm191_vm0 = vcmask 261120   ;;  %p1444_p11 = scmp.ne.s32.totalorder %s2176_s27, %s1443_s4 }
  0x14   : > { %1303 = vmatprep.subr.mxu0 %v183_v0  ;;  %1323 = vmatprep.subr.mxu1 %v183_v0  ;;  %v180_v3 = vld [vmem:[%s2223_s1] sm:$0xff]  ;;  %s1243_s6 = sshll.u32 %s2245_s28, 3  ;;  %v1505_v48 = vmov 683565275   ;;  %v1506_v52 = vmov 2475754826  }
  0x15   : > { %1304 = vmatpush3.msra.mxu0 %v183_v0  ;;  %1327 = vmatpush3.msra.mxu1 %v183_v0  ;;  %s169_s9 = scalar_lea.vmem %s2222_s0, %s1243_s6  ;;  %v1609_v12 = vld [vmem:[%s2224_s2] ss:$0 sm:$0xff]  ;;  %v1507_v54 = vmov 2131351028   ;;  %v1508_v56 = vmov 2102212464   ;;  %p1445_p12 = pnand %p1444_p11, %p1572_p5 }
  0x16   : > { %1305 = vmatprep.subr.mxu0 %v182_v1  ;;  %1324 = vmatprep.subr.mxu1 %v182_v1  ;;  %v172_v4 = vld [vmem:[%s169_s9] sm:$0xff]  ;;  %v173_v6 = vld [vmem:[%s169_s9 + $0x8] sm:$0xff]  ;;  %v174_v8 = vld [vmem:[%s169_s9 + $0x10] sm:$0xff]  ;;  %v1509_v58 = vmov 920167782   ;;  %s1447_s6 = sshll.u32 %s1511_s5, 4  ;;  %s1448_s6 = int_to_ptr.vmem [resolvable:$false] %s1447_s6 }
  0x17   : > { %1306 = vmatpush3.msra.mxu0 %v182_v1  ;;  %1328 = vmatpush3.msra.mxu1 %v182_v1  ;;  %v176_v5 = vld [vmem:[%s169_s9 + $0x20] sm:$0xff]  ;;  %v177_v7 = vld [vmem:[%s169_s9 + $0x28] sm:$0xff]  ;;  %v178_v9 = vld [vmem:[%s169_s9 + $0x30] sm:$0xff]  ;;  %v1510_v1 = vmov 1326507024   ;;  %p1446_p13 = pneg %p1445_p12  ;;  %s1449_s7 = scalar_lea.vmem %s1448_s6, 2048 }
  0x18   : > { %1307 = vmatprep.subr.mxu0 %v181_v2  ;;  %1325 = vmatprep.subr.mxu1 %v181_v2  ;;  %v175_v10 = vld [vmem:[%s169_s9 + $0x18] sm:$0xff]  ;;  %p1450_p0 = scmp.lt.s32.totalorder %s2176_s27, %s1448_s6  ;;  %p1451_p1 = scmp.lt.s32.totalorder %s1449_s7, %s1443_s4 }
  0x19   : > { %1308 = vmatpush3.msra.mxu0 %v181_v2  ;;  %1329 = vmatpush3.msra.mxu1 %v181_v2  ;;  %v179_v11 = vld [vmem:[%s169_s9 + $0x38] sm:$0xff] }
  0x1a   : > { %1309 = vmatprep.subr.mxu0 %v180_v3  ;;  %1326 = vmatprep.subr.mxu1 %v180_v3  ;;  %p1452_p2 = por %p1451_p1, %p1450_p0 }
  0x1b   : > { %1310 = vmatpush3.msra.mxu0 %v180_v3  ;;  %1330 = vmatpush3.msra.mxu1 %v180_v3 }
  0x1c   : > { %1311 = vmatprep.mubr.msk.f32.mxu0 %vm191_vm0, %v172_v4  ;;  %1317 = vmatprep.mubr.msk.f32.mxu1 %vm191_vm0, %v176_v5  ;;  %p1453_p3 = pnand %p1452_p2, %p1446_p13 }
  0x1d   : > { %1312 = vmatmul.mubr.msk.f32.vlgmr.msra.gmra.mxu0 %vm191_vm0, %v173_v6  ;;  %1318 = vmatmul.mubr.msk.f32.vlgmr.msra.gmra.mxu1 %vm191_vm0, %v177_v7 }
  0x1e   : > { %1314 = vmatprep.mubr.msk.f32.mxu0 %vm191_vm0, %v174_v8  ;;  %1320 = vmatprep.mubr.msk.f32.mxu1 %vm191_vm0, %v178_v9 }
  0x21   : > { %1315 = vmatmul.mubr.msk.f32.gmra.mxu0 %vm191_vm0, %v175_v10  ;;  %1321 = vmatmul.mubr.msk.f32.gmra.mxu1 %vm191_vm0, %v179_v11 }
  0xdd   : > { %v1313_v13 = vpop.f32.mrf.mxu0  ;;  %v1319_v14 = vpop.f32.mrf.mxu1 }
  0xde   : > { %v1612_v15 = vadd.f32 %v1313_v13, %v1609_v12  ;;  %v1615_v16 = vadd.f32 %v1319_v14, %v1609_v12 }
  0xdf   : > { %v282_v17 = vpop.f32.mrf.mxu0  ;;  %v302_v36 = vpop.f32.mrf.mxu1 }
  0xe0   : > { %v425_v18 = vand.u32 2147483647, %v1612_v15  ;;  %v428_v19 = vand.u32 2139095040, %v1612_v15  ;;  %v841_v20 = vand.u32 2147483647, %v1615_v16  ;;  %v844_v21 = vand.u32 2139095040, %v1615_v16 }
  0xe1   : > { %v1624_v24 = vadd.f32 %v1609_v12, %v282_v17  ;;  %v1631_v42 = vadd.f32 %v1609_v12, %v302_v36  ;;  %vm427_vm14 = vcmp.lt.s32.totalorder %v1612_v15, 0 }
  0xe2   : > { %v429_v22 = vshrl.u32 %v428_v19, 23  ;;  %v432_v23 = vand.u32 8388607, %v425_v18  ;;  %v845_v25 = vshrl.u32 %v844_v21, 23  ;;  %v848_v26 = vand.u32 8388607, %v841_v20 }
  0xe3   : > { %v324_v29 = vand.u32 2139095040, %v1624_v24  ;;  %v321_v34 = vand.u32 2147483647, %v1624_v24  ;;  %vm1736_vm15 = vcmp.le.f32.partialorder %v425_v18, 0.7853982 }
  0xe4   : > { %v1257_v27 = vadd.s32 4294967169, %v429_v22  ;;  %v1273_v28 = vadd.s32 4294967169, %v845_v25  ;;  %v433_v30 = vor.u32 8388608, %v432_v23  ;;  %v849_v32 = vor.u32 8388608, %v848_v26 }
  0xe5   : > { %v325_v35 = vshrl.u32 %v324_v29, 23  ;;  %v1641_v46 = vand.u32 8388607, %v321_v34 }
  0xe6   : > { %v435_v31 = vadd.s32 1, %v1257_v27  ;;  %v851_v33 = vadd.s32 1, %v1273_v28  ;;  %v1633_v43 = vshll.u32 %v433_v30, 8  ;;  %v1637_v45 = vshll.u32 %v849_v32, 8 }
  0xe7   : > { %v1253_v38 = vadd.s32 4294967169, %v325_v35 }
  0xe8   : > { %vm436_vm1 = vcmp.gt.s32.totalorder %v435_v31, 0  ;;  %vm852_vm2 = vcmp.gt.s32.totalorder %v851_v33, 0 }
  0xe9   : > { %v437_v37 = vsel %vm436_vm1, %v435_v31, 0  ;;  %v853_v41 = vsel %vm852_vm2, %v851_v33, 0  ;;  %v1644_v51 = vadd.s32 1, %v1253_v38 }
  0xea   : > { %v438_v39 = vshrl.u32 %v437_v37, 5  ;;  %v439_v40 = vand.u32 31, %v437_v37  ;;  %v1635_v44 = vshrl.u32 %v853_v41, 5  ;;  %v855_v50 = vand.u32 31, %v853_v41 }
  0xeb   : > { %vm332_vm12 = vcmp.gt.s32.totalorder %v1644_v51, 0 }
  0xec   : > { %v440_v47 = vsub.s32 32, %v439_v40  ;;  %v442_v49 = vshll.u32 %v1505_v48, %v439_v40  ;;  %v445_v53 = vshll.u32 %v1506_v52, %v439_v40  ;;  %v448_v55 = vshll.u32 %v1507_v54, %v439_v40 }
  0xed   : > { %v451_v57 = vshll.u32 %v1508_v56, %v439_v40  ;;  %v454_v59 = vshll.u32 %v1509_v58, %v439_v40  ;;  %vm457_vm3 = vcmp.lt.s32.totalorder %v438_v39, 1  ;;  %vm458_vm4 = vcmp.lt.s32.totalorder %v438_v39, 2 }
  0xee   : > { %v443_v60 = vshrl.u32 %v1506_v52, %v440_v47  ;;  %v446_v61 = vshrl.u32 %v1507_v54, %v440_v47  ;;  %v449_v62 = vshrl.u32 %v1508_v56, %v440_v47  ;;  %v441_v63 = vshrl.u32 %v1505_v48, %v440_v47 }
  0xef   : > { %v452_v0 = vshrl.u32 %v1509_v58, %v440_v47  ;;  %v455_v2 = vshrl.u32 %v1510_v1, %v440_v47  ;;  %v856_v6 = vsub.s32 32, %v855_v50  ;;  %vm459_vm5 = vcmp.lt.s32.totalorder %v438_v39, 3 }
  0xf0   : > { %v444_v3 = vor.u32 %v443_v60, %v442_v49  ;;  %v447_v4 = vor.u32 %v446_v61, %v445_v53  ;;  %v450_v5 = vor.u32 %v449_v62, %v448_v55  ;;  %vm460_vm6 = vcmp.lt.s32.totalorder %v438_v39, 4 }
  0xf1   : > { %v453_v7 = vor.u32 %v452_v0, %v451_v57  ;;  %v456_v8 = vor.u32 %v455_v2, %v454_v59  ;;  %v858_v21 = vshll.u32 %v1505_v48, %v855_v50  ;;  %v859_v25 = vshrl.u32 %v1506_v52, %v856_v6 }
  0xf2   : > { %v461_v9 = vsel %vm457_vm3, %v441_v63, %v444_v3  ;;  %v462_v10 = vsel %vm460_vm6, %v450_v5, 2102212464  ;;  %v465_v11 = vsel %vm457_vm3, %v444_v3, %v447_v4  ;;  %v469_v13 = vsel %vm457_vm3, %v447_v4, %v450_v5 }
  0xf3   : > { %v463_v14 = vsel %vm459_vm5, %v447_v4, %v462_v10  ;;  %v466_v17 = vsel %vm460_vm6, %v453_v7, 920167782  ;;  %v470_v19 = vsel %vm460_vm6, %v456_v8, 1326507024  ;;  %v861_v26 = vshll.u32 %v1506_v52, %v855_v50 }
  0xf4   : > { %v467_v22 = vsel %vm459_vm5, %v450_v5, %v466_v17  ;;  %v471_v23 = vsel %vm459_vm5, %v453_v7, %v470_v19  ;;  %v464_v27 = vsel %vm458_vm4, %v461_v9, %v463_v14  ;;  %v862_v30 = vshrl.u32 %v1507_v54, %v856_v6 }
  0xf5   : > { %v468_v28 = vsel %vm458_vm4, %v465_v11, %v467_v22  ;;  %v472_v29 = vsel %vm458_vm4, %v469_v13, %v471_v23  ;;  %v860_v36 = vor.u32 %v859_v25, %v858_v21  ;;  %v864_v38 = vshll.u32 %v1507_v54, %v855_v50 }
  0xf6   : > { %v1667_v31 = vmul.u32.u64.low %v1633_v43, %v472_v29  ;;  %v1668_v32 = vmul.u32.u64.high %v1633_v43, %v472_v29, %v1667_v31  ;;  %v1671_v33 = vmul.u32.u64.low %v1633_v43, %v468_v28  ;;  %v1672_v35 = vmul.u32.u64.high %v1633_v43, %v468_v28, %v1671_v33 }
  0xf7   : > { %v863_v37 = vor.u32 %v862_v30, %v861_v26  ;;  %v865_v40 = vshrl.u32 %v1508_v56, %v856_v6  ;;  %v857_v41 = vshrl.u32 %v1505_v48, %v856_v6  ;;  %v867_v39 = vshll.u32 %v1508_v56, %v855_v50 }
  0xf8   : > { %v868_v47 = vshrl.u32 %v1509_v58, %v856_v6  ;;  %v871_v49 = vshrl.u32 %v1510_v1, %v856_v6  ;;  %v480_v53 = vmul.u32 %v1633_v43, %v464_v27  ;;  %v870_v57 = vshll.u32 %v1509_v58, %v855_v50 }
  0xf9   : > { %v866_v55 = vor.u32 %v865_v40, %v864_v38  ;;  %vm873_vm7 = vcmp.lt.s32.totalorder %v1635_v44, 1  ;;  %vm482_vm8 = vc.u32 %v1668_v32, %v1671_v33  ;;  %v483_v59 = vadd.s32 1, %v1672_v35 }
  0xfa   : > { %v869_v60 = vor.u32 %v868_v47, %v867_v39  ;;  %vm874_vm9 = vcmp.lt.s32.totalorder %v1635_v44, 2  ;;  %v872_v61 = vor.u32 %v871_v49, %v870_v57  ;;  %vm875_vm10 = vcmp.lt.s32.totalorder %v1635_v44, 3 }
  0xfb   : > { %vm876_vm11 = vcmp.lt.s32.totalorder %v1635_v44, 4  ;;  %v881_v62 = vsel %vm873_vm7, %v860_v36, %v863_v37  ;;  %v484_v43 = vsel %vm482_vm8, %v483_v59, %v1672_v35  ;;  %v885_v50 = vsel %vm873_vm7, %v863_v37, %v866_v55 }
  0xfc   : > { %v878_v63 = vsel %vm876_vm11, %v866_v55, 2102212464  ;;  %v882_v0 = vsel %vm876_vm11, %v869_v60, 920167782  ;;  %v485_v2 = vadd.s32 %v484_v43, %v480_v53  ;;  %v877_v3 = vsel %vm873_vm7, %v857_v41, %v860_v36 }
  0xfd   : > { %v883_v4 = vsel %vm875_vm10, %v866_v55, %v882_v0  ;;  %v886_v5 = vsel %vm876_vm11, %v872_v61, 1326507024  ;;  %v879_v6 = vsel %vm875_vm10, %v863_v37, %v878_v63  ;;  %v333_v19 = vsel %vm332_vm12, %v1644_v51, 0 }
  0xfe   : > { %v884_v7 = vsel %vm874_vm9, %v881_v62, %v883_v4  ;;  %v887_v8 = vsel %vm875_vm10, %v869_v60, %v886_v5  ;;  %v486_v9 = vadd.s32 536870912, %v485_v2  ;;  %v880_v22 = vsel %vm874_vm9, %v877_v3, %v879_v6 }
  0xff   : > { %v888_v10 = vsel %vm874_vm9, %v885_v50, %v887_v8  ;;  %v1695_v11 = vmul.u32.u64.low %v1637_v45, %v884_v7  ;;  %v1696_v13 = vmul.u32.u64.high %v1637_v45, %v884_v7, %v1695_v11  ;;  %v335_v23 = vand.u32 31, %v333_v19 }
 0x100   : > { %v1700_v14 = vmul.u32.u64.low %v1637_v45, %v888_v10  ;;  %v1701_v17 = vmul.u32.u64.high %v1637_v45, %v888_v10, %v1700_v14  ;;  %v487_v21 = vshrl.u32 %v486_v9, 30  ;;  %v740_v25 = vand.u32 2139095040, %v1631_v42 }
 0x101   : > { %v899_v27 = vadd.s32 1, %v1696_v13  ;;  %v329_v28 = vor.u32 8388608, %v1641_v46  ;;  %v896_v29 = vmul.u32 %v1637_v45, %v880_v22  ;;  %v336_v30 = vsub.s32 32, %v335_v23 }
 0x102   : > { %v488_v26 = vshll.u32 %v487_v21, 30  ;;  %vm898_vm13 = vc.u32 %v1701_v17, %v1695_v11  ;;  %v741_v44 = vshrl.u32 %v740_v25, 23  ;;  %v481_v36 = vadd.s32 %v1671_v33, %v1668_v32 }
 0x103   : > { %v900_v51 = vsel %vm898_vm13, %v899_v27, %v1696_v13  ;;  %v1718_v38 = vshll.u32 %v329_v28, 8  ;;  %v737_v45 = vand.u32 2147483647, %v1631_v42  ;;  %v1721_v40 = vshrl.u32 %v333_v19, 5 }
 0x104   : > { %v1712_v31 = vsub.s32 %v485_v2, %v488_v26  ;;  %v901_v35 = vadd.s32 %v900_v51, %v896_v29  ;;  %v339_v41 = vshrl.u32 %v1506_v52, %v336_v30  ;;  %v342_v39 = vshrl.u32 %v1507_v54, %v336_v30 }
 0x105   : > { %v345_v49 = vshrl.u32 %v1508_v56, %v336_v30  ;;  %v348_v53 = vshrl.u32 %v1509_v58, %v336_v30  ;;  %v1728_v32 = vadd.s32 4294967169, %v741_v44  ;;  %v511_v33 = vsub.s32 4, %v487_v21 }
 0x106   : > { %v491_v37 = vsub.s32 0, %v1712_v31  ;;  %v902_v46 = vadd.s32 536870912, %v901_v35  ;;  %v338_v57 = vshll.u32 %v1505_v48, %v335_v23  ;;  %v341_v59 = vshll.u32 %v1506_v52, %v335_v23 }
 0x107   : > { %v344_v62 = vshll.u32 %v1507_v54, %v335_v23  ;;  %v347_v43 = vshll.u32 %v1508_v56, %v335_v23  ;;  %v351_v63 = vshrl.u32 %v1510_v1, %v336_v30  ;;  %v1746_v3 = vand.u32 8388607, %v737_v45 }
 0x108   : > { %v1258_v47 = vmin.u32 %v491_v37, %v1712_v31  ;;  %v1730_v55 = vshrl.u32 %v902_v46, 30  ;;  %v340_v50 = vor.u32 %v339_v41, %v338_v57  ;;  %v343_v2 = vor.u32 %v342_v39, %v341_v59 }
 0x109   : > { %v346_v18 = vor.u32 %v345_v49, %v344_v62  ;;  %v349_v5 = vor.u32 %v348_v53, %v347_v43  ;;  %v350_v6 = vshll.u32 %v1509_v58, %v335_v23  ;;  %v512_v7 = vsel %vm427_vm14, %v511_v33, %v487_v21 }
 0x10a   : > { %v493_v61 = vclz %v1258_v47  ;;  %v904_v0 = vshll.u32 %v1730_v55, 30  ;;  %v337_v9 = vshrl.u32 %v1505_v48, %v336_v30  ;;  %vm353_vm0 = vcmp.lt.s32.totalorder %v1721_v40, 1 }
 0x10b   : > { %v352_v10 = vor.u32 %v351_v63, %v350_v6  ;;  %vm354_vm2 = vcmp.lt.s32.totalorder %v1721_v40, 2  ;;  %vm355_vm3 = vcmp.lt.s32.totalorder %v1721_v40, 3  ;;  %vm843_vm4 = vcmp.lt.s32.totalorder %v1615_v16, 0 }
 0x10c   : > { %v1259_v4 = vadd.s32 4294967294, %v493_v61  ;;  %v1751_v8 = vsub.s32 %v901_v35, %v904_v0  ;;  %vm356_vm5 = vcmp.lt.s32.totalorder %v1721_v40, 4  ;;  %v361_v19 = vsel %vm353_vm0, %v340_v50, %v343_v2 }
 0x10d   : > { %v358_v23 = vsel %vm356_vm5, %v346_v18, 2102212464  ;;  %v362_v25 = vsel %vm356_vm5, %v349_v5, 920167782  ;;  %v365_v29 = vsel %vm353_vm0, %v343_v2, %v346_v18  ;;  %v366_v35 = vsel %vm356_vm5, %v352_v10, 1326507024 }
 0x10e   : > { %vm1260_vm1 = vcmp.lt.s32.totalorder %v1259_v4, 0  ;;  %v907_v14 = vsub.s32 0, %v1751_v8  ;;  %v363_v28 = vsel %vm355_vm3, %v346_v18, %v362_v25  ;;  %v514_v37 = vsel %vm1736_vm15, 0, %v512_v7 }
 0x10f   : > { %v496_v13 = vsel %vm1260_vm1, 0, %v1259_v4  ;;  %v364_v44 = vsel %vm354_vm2, %v361_v19, %v363_v28  ;;  %vm1774_vm6 = vcmp.le.f32.partialorder %v841_v20, 0.7853982  ;;  %v357_v41 = vsel %vm353_vm0, %v337_v9, %v340_v50 }
 0x110   : > { %v497_v21 = vsub.s32 32, %v496_v13  ;;  %v501_v22 = vsub.s32 4294967266, %v496_v13  ;;  %v498_v26 = vshll.u32 %v1712_v31, %v496_v13  ;;  %v1274_v27 = vmin.u32 %v907_v14, %v1751_v8 }
 0x111   : > { %v927_v49 = vsub.s32 4, %v1730_v55  ;;  %v367_v53 = vsel %vm355_vm3, %v349_v5, %v366_v35  ;;  %v1788_v57 = vmul.u32.u64.low %v1718_v38, %v364_v44  ;;  %v1789_v59 = vmul.u32.u64.high %v1718_v38, %v364_v44, %v1788_v57 }
 0x112   : > { %v499_v30 = vshrl.u32 %v481_v36, %v497_v21  ;;  %v502_v51 = vadd.s32 127, %v501_v22  ;;  %v909_v46 = vclz %v1274_v27  ;;  %v359_v36 = vsel %vm355_vm3, %v343_v2, %v358_v23  ;;  %v1316_v21 = vpop.f32.mrf.mxu0 }
 0x113   : > { %v368_v20 = vsel %vm354_vm2, %v365_v29, %v367_v53  ;;  %v360_v62 = vsel %vm354_vm2, %v357_v41, %v359_v36  ;;  %v518_v0 = vadd.s32 3, %v514_v37  ;;  %v897_v50 = vadd.s32 %v1695_v11, %v1701_v17 }
 0x114   : > { %v500_v39 = vor.u32 %v499_v30, %v498_v26  ;;  %v503_v47 = vshll.u32 %v502_v51, 23  ;;  %v1275_v33 = vadd.s32 4294967294, %v909_v46  ;;  %v747_v2 = vadd.s32 1, %v1728_v32 }
 0x115   : > { %v1795_v43 = vmul.u32.u64.low %v1718_v38, %v368_v20  ;;  %v1796_v63 = vmul.u32.u64.high %v1718_v38, %v368_v20, %v1795_v43  ;;  %v928_v6 = vsel %vm843_vm4, %v927_v49, %v1730_v55  ;;  %v376_v9 = vmul.u32 %v1718_v38, %v360_v62 }
 0x116   : > { %v504_v61 = vor.u32 4788187, %v503_v47  ;;  %vm1276_vm7 = vcmp.lt.s32.totalorder %v1275_v33, 0  ;;  %v507_v18 = vcvt.s32.f32 %v500_v39  ;;  %v379_v10 = vadd.s32 1, %v1789_v59 }
 0x117   : > { %v912_v5 = vsel %vm1276_vm7, 0, %v1275_v33  ;;  %vm378_vm8 = vc.u32 %v1796_v63, %v1788_v57  ;;  %vm748_vm9 = vcmp.gt.s32.totalorder %v747_v2, 0  ;;  %v930_v22 = vsel %vm1774_vm6, 0, %v928_v6 }
 0x118   : > { %v505_v4 = vand.u32 2147483647, %v504_v61  ;;  %v913_v40 = vsub.s32 32, %v912_v5  ;;  %v917_v7 = vsub.s32 4294967266, %v912_v5  ;;  %v914_v14 = vshll.u32 %v1751_v8, %v912_v5 }
 0x119   : > { %v380_v32 = vsel %vm378_vm8, %v379_v10, %v1789_v59  ;;  %v749_v19 = vsel %vm748_vm9, %v747_v2, 0  ;;  %v1815_v29 = vadd.f32 %v1316_v21, %v1609_v12  ;;  %v1820_v51 = vand.u32 3, %v518_v0 }
 0x11a   : > { %v508_v13 = vmul.f32 %v507_v18, %v505_v4  ;;  %v915_v11 = vshrl.u32 %v897_v50, %v913_v40  ;;  %v918_v17 = vadd.s32 127, %v917_v7  ;;  %v381_v38 = vadd.s32 %v380_v32, %v376_v9 }
 0x11b   : > { %v751_v23 = vand.u32 31, %v749_v19  ;;  %v1822_v35 = vadd.s32 3, %v930_v22  ;;  %v745_v46 = vor.u32 8388608, %v1746_v3  ;;  %vm323_vm10 = vcmp.lt.s32.totalorder %v1624_v24, 0 }
 0x11c   : > { %v509_v55 = vxor.u32 2147483648, %v508_v13  ;;  %v916_v25 = vor.u32 %v915_v11, %v914_v14  ;;  %v919_v26 = vshll.u32 %v918_v17, 23  ;;  %v382_v27 = vadd.s32 536870912, %v381_v38 }
 0x11d   : > { %v752_v28 = vsub.s32 32, %v751_v23  ;;  %v1828_v49 = vshrl.u32 %v749_v19, 5  ;;  %v754_v53 = vshll.u32 %v1505_v48, %v751_v23  ;;  %v757_v59 = vshll.u32 %v1506_v52, %v751_v23 }
 0x11e   : > { %v510_v8 = vsel %vm427_vm14, %v509_v55, %v508_v13  ;;  %v920_v44 = vor.u32 4788187, %v919_v26  ;;  %v383_v37 = vshrl.u32 %v382_v27, 30  ;;  %v923_v39 = vcvt.s32.f32 %v916_v25 }
 0x11f   : > { %v513_v30 = vsel %vm1736_vm15, %v1612_v15, %v510_v8  ;;  %v755_v41 = vshrl.u32 %v1506_v52, %v752_v28  ;;  %v758_v47 = vshrl.u32 %v1507_v54, %v752_v28  ;;  %v761_v33 = vshrl.u32 %v1508_v56, %v752_v28 }
 0x120   : > { %1410 = vcosq.f32 %v513_v30  ;;  %v921_v36 = vand.u32 2147483647, %v920_v44  ;;  %v384_v60 = vshll.u32 %v383_v37, 30  ;;  %v763_v3 = vshll.u32 %v1508_v56, %v751_v23 }
 0x121   : > { %1412 = vsinq.f32 %v513_v30  ;;  %v764_v61 = vshrl.u32 %v1509_v58, %v752_v28  ;;  %v756_v43 = vor.u32 %v755_v41, %v754_v53  ;;  %v760_v0 = vshll.u32 %v1507_v54, %v751_v23 }
 0x122   : > { %v924_v20 = vmul.f32 %v923_v39, %v921_v36  ;;  %v1835_v62 = vsub.s32 %v381_v38, %v384_v60  ;;  %v636_v50 = vand.u32 2139095040, %v1815_v29  ;;  %v759_v4 = vor.u32 %v758_v47, %v757_v59 }
 0x123   : > { %v765_v18 = vor.u32 %v764_v61, %v763_v3  ;;  %v767_v5 = vshrl.u32 %v1510_v1, %v752_v28  ;;  %v377_v6 = vadd.s32 %v1788_v57, %v1796_v63  ;;  %v762_v7 = vor.u32 %v761_v33, %v760_v0 }
 0x124   : > { %v925_v2 = vxor.u32 2147483648, %v924_v20  ;;  %v387_v40 = vsub.s32 0, %v1835_v62  ;;  %v766_v9 = vshll.u32 %v1509_v58, %v751_v23  ;;  %vm524_vm11 = vcmp.eq.s32.totalorder %v1820_v51, 2 }
 0x125   : > { %v407_v13 = vsub.s32 4, %v383_v37  ;;  %vm769_vm12 = vcmp.lt.s32.totalorder %v1828_v49, 1  ;;  %v1848_v14 = vshll.u32 %v745_v46, 8  ;;  %vm521_vm13 = vcmp.eq.s32.totalorder %v1820_v51, 0 }
 0x126   : > { %v926_v10 = vsel %vm843_vm4, %v925_v2, %v924_v20  ;;  %v1254_v63 = vmin.u32 %v387_v40, %v1835_v62  ;;  %v768_v11 = vor.u32 %v767_v5, %v766_v9  ;;  %vm772_vm14 = vcmp.lt.s32.totalorder %v1828_v49, 4 }
 0x127   : > { %v929_v57 = vsel %vm1774_vm6, %v1615_v16, %v926_v10  ;;  %vm520_vm15 = vcmp.lt.s32.totalorder %v1820_v51, 2  ;;  %v753_v17 = vshrl.u32 %v1505_v48, %v752_v28  ;;  %v777_v32 = vsel %vm769_vm12, %v756_v43, %v759_v4 }
 0x128   : > { %1414 = vcosq.f32 %v929_v57  ;;  %v778_v19 = vsel %vm772_vm14, %v765_v18, 920167782  ;;  %vm517_vm0 = vweird.f32 %v1612_v15  ;;  %vm1865_vm1 = vcmp.le.f32.partialorder %v321_v34, 0.7853982 }
 0x129   : > { %1416 = vsinq.f32 %v929_v57  ;;  %v389_v21 = vclz %v1254_v63  ;;  %vm771_vm2 = vcmp.lt.s32.totalorder %v1828_v49, 3  ;;  %v774_v55 = vsel %vm772_vm14, %v762_v7, 2102212464 }
 0x12a   : > { %v408_v22 = vsel %vm323_vm10, %v407_v13, %v383_v37  ;;  %vm770_vm3 = vcmp.lt.s32.totalorder %v1828_v49, 2  ;;  %v779_v38 = vsel %vm771_vm2, %v762_v7, %v778_v19  ;;  %v781_v34 = vsel %vm769_vm12, %v759_v4, %v762_v7 }
 0x12b   : > { %v1255_v23 = vadd.s32 4294967294, %v389_v21  ;;  %v773_v25 = vsel %vm769_vm12, %v753_v17, %v756_v43  ;;  %v780_v26 = vsel %vm770_vm3, %v777_v32, %v779_v38  ;;  %v782_v8 = vsel %vm772_vm14, %v768_v11, 1326507024 }
 0x12c   : > { %v775_v28 = vsel %vm771_vm2, %v759_v4, %v774_v55  ;;  %v783_v30 = vsel %vm771_vm2, %v765_v18, %v782_v8  ;;  %v1885_v44 = vmul.u32.u64.low %v1848_v14, %v780_v26  ;;  %v1886_v37 = vmul.u32.u64.high %v1848_v14, %v780_v26, %v1885_v44 }
 0x12d   : > { %v1411_v27 = vpop.eup %1410  ;;  %vm1256_vm4 = vcmp.lt.s32.totalorder %v1255_v23, 0  ;;  %v784_v36 = vsel %vm770_vm3, %v781_v34, %v783_v30  ;;  %v637_v39 = vshrl.u32 %v636_v50, 23  ;;  %v776_v61 = vsel %vm770_vm3, %v773_v25, %v775_v28 }
 0x12e   : > { %v1413_v46 = vpop.eup %1412  ;;  %v525_v41 = vxor.u32 2147483648, %v1411_v27  ;;  %v392_v60 = vsel %vm1256_vm4, 0, %v1255_v23  ;;  %v1894_v53 = vmul.u32.u64.low %v1848_v14, %v784_v36  ;;  %v1895_v33 = vmul.u32.u64.high %v1848_v14, %v784_v36, %v1894_v53 }
 0x12f   : > { %v522_v47 = vxor.u32 2147483648, %v1413_v46  ;;  %v393_v59 = vsub.s32 32, %v392_v60  ;;  %v397_v3 = vsub.s32 4294967266, %v392_v60  ;;  %v935_v0 = vand.u32 3, %v1822_v35  ;;  %v1322_v35 = vpop.f32.mrf.mxu1 }
 0x130   : > { %v526_v20 = vsel %vm524_vm11, %v525_v41, %v1413_v46  ;;  %v795_v50 = vadd.s32 1, %v1886_v37  ;;  %v1265_v2 = vadd.s32 4294967169, %v637_v39  ;;  %v394_v18 = vshll.u32 %v1835_v62, %v392_v60 }
 0x131   : > { %v523_v43 = vsel %vm521_vm13, %v1411_v27, %v522_v47  ;;  %v395_v5 = vshrl.u32 %v377_v6, %v393_v59  ;;  %v398_v40 = vadd.s32 127, %v397_v3  ;;  %v410_v49 = vsel %vm1865_vm1, 0, %v408_v22 }
 0x132   : > { %v527_v4 = vsel %vm520_vm15, %v523_v43, %v526_v20  ;;  %v792_v9 = vmul.u32 %v1848_v14, %v776_v61  ;;  %vm794_vm5 = vc.u32 %v1895_v33, %v1885_v44  ;;  %v643_v10 = vadd.s32 1, %v1265_v2 }
 0x133   : > { %v528_v7 = vsel %vm517_vm0, nan, %v527_v4  ;;  %v396_v51 = vor.u32 %v395_v5, %v394_v18  ;;  %v399_v62 = vshll.u32 %v398_v40, 23  ;;  %v796_v6 = vsel %vm794_vm5, %v795_v50, %v1886_v37 }
 0x134   : > { %1154 = vst [vmem:[%s1915_s20 + $0x8] sm:$0xff] %v528_v7  ;;  %v797_v15 = vadd.s32 %v796_v6, %v792_v9  ;;  %v633_v13 = vand.u32 2147483647, %v1815_v29  ;;  %vm940_vm6 = vcmp.eq.s32.totalorder %v935_v0, 2  ;;  %vm644_vm7 = vcmp.gt.s32.totalorder %v643_v10, 0 }
 0x135   : > { %v1415_v57 = vpop.eup %1414  ;;  %v400_v63 = vor.u32 4788187, %v399_v62  ;;  %v1921_v14 = vadd.f32 %v1322_v35, %v1609_v12  ;;  %v414_v32 = vadd.s32 3, %v410_v49  ;;  %v645_v21 = vsel %vm644_vm7, %v643_v10, 0 }
 0x136   : > { %v1417_v11 = vpop.eup %1416  ;;  %v941_v17 = vxor.u32 2147483648, %v1415_v57  ;;  %v798_v19 = vadd.s32 536870912, %v797_v15  ;;  %v403_v38 = vcvt.s32.f32 %v396_v51  ;;  %v647_v34 = vand.u32 31, %v645_v21 }
 0x137   : > { %v938_v55 = vxor.u32 2147483648, %v1417_v11  ;;  %v401_v22 = vand.u32 2147483647, %v400_v63  ;;  %vm937_vm8 = vcmp.eq.s32.totalorder %v935_v0, 0  ;;  %v640_v26 = vand.u32 8388607, %v633_v13 }
 0x138   : > { %v942_v23 = vsel %vm940_vm6, %v941_v17, %v1417_v11  ;;  %v1923_v25 = vshrl.u32 %v798_v19, 30  ;;  %vm936_vm9 = vcmp.lt.s32.totalorder %v935_v0, 2  ;;  %v648_v28 = vsub.s32 32, %v647_v34 }
 0x139   : > { %v939_v8 = vsel %vm937_vm8, %v1415_v57, %v938_v55  ;;  %v404_v27 = vmul.f32 %v403_v38, %v401_v22  ;;  %vm933_vm11 = vweird.f32 %v1615_v16  ;;  %v1929_v36 = vand.u32 3, %v414_v32 }
 0x13a   : > { %v943_v30 = vsel %vm936_vm9, %v939_v8, %v942_v23  ;;  %v800_v37 = vshll.u32 %v1923_v25, 30  ;;  %v651_v39 = vshrl.u32 %v1506_v52, %v648_v28  ;;  %v641_v60 = vor.u32 8388608, %v640_v26 }
 0x13b   : > { %v944_v46 = vsel %vm933_vm11, nan, %v943_v30  ;;  %v405_v41 = vxor.u32 2147483648, %v404_v27  ;;  %v654_v53 = vshrl.u32 %v1507_v54, %v648_v28  ;;  %v1052_v20 = vand.u32 2139095040, %v1921_v14 }
 0x13c   : > { %1158 = vst [vmem:[%s1915_s20 + $0x28] sm:$0xff] %v944_v46  ;;  %v1933_v47 = vsub.s32 %v797_v15, %v800_v37  ;;  %v646_v59 = vshrl.u32 %v645_v21, 5  ;;  %v650_v3 = vshll.u32 %v1505_v48, %v647_v34  ;;  %v657_v61 = vshrl.u32 %v1508_v56, %v648_v28 }
 0x13d   : > { %v406_v16 = vsel %vm323_vm10, %v405_v41, %v404_v27  ;;  %v653_v50 = vshll.u32 %v1506_v52, %v647_v34  ;;  %v656_v2 = vshll.u32 %v1507_v54, %v647_v34  ;;  %v659_v18 = vshll.u32 %v1508_v56, %v647_v34 }
 0x13e   : > { %v409_v43 = vsel %vm1865_vm1, %v1624_v24, %v406_v16  ;;  %v803_v0 = vsub.s32 0, %v1933_v47  ;;  %v652_v4 = vor.u32 %v651_v39, %v650_v3  ;;  %v660_v5 = vshrl.u32 %v1509_v58, %v648_v28 }
 0x13f   : > { %1418 = vcosq.f32 %v409_v43  ;;  %v655_v7 = vor.u32 %v654_v53, %v653_v50  ;;  %v658_v49 = vor.u32 %v657_v61, %v656_v2  ;;  %v662_v31 = vshll.u32 %v1509_v58, %v647_v34 }
 0x140   : > { %1420 = vsinq.f32 %v409_v43  ;;  %v1270_v40 = vmin.u32 %v803_v0, %v1933_v47  ;;  %v661_v9 = vor.u32 %v660_v5, %v659_v18  ;;  %v663_v35 = vshrl.u32 %v1510_v1, %v648_v28 }
 0x141   : > { %v681_v51 = vshll.u32 %v641_v60, 8  ;;  %v649_v6 = vshrl.u32 %v1505_v48, %v648_v28  ;;  %vm665_vm10 = vcmp.lt.s32.totalorder %v646_v59, 1  ;;  %v1053_v10 = vshrl.u32 %v1052_v20, 23 }
 0x142   : > { %v805_v62 = vclz %v1270_v40  ;;  %v664_v15 = vor.u32 %v663_v35, %v662_v31  ;;  %vm666_vm12 = vcmp.lt.s32.totalorder %v646_v59, 2  ;;  %vm667_vm13 = vcmp.lt.s32.totalorder %v646_v59, 3 }
 0x143   : > { %vm668_vm14 = vcmp.lt.s32.totalorder %v646_v59, 4  ;;  %v673_v11 = vsel %vm665_vm10, %v652_v4, %v655_v7  ;;  %v669_v32 = vsel %vm665_vm10, %v649_v6, %v652_v4  ;;  %v677_v21 = vsel %vm665_vm10, %v655_v7, %v658_v49 }
 0x144   : > { %v1271_v57 = vadd.s32 4294967294, %v805_v62  ;;  %v670_v63 = vsel %vm668_vm14, %v658_v49, 2102212464  ;;  %v674_v17 = vsel %vm668_vm14, %v661_v9, 920167782  ;;  %vm739_vm0 = vcmp.lt.s32.totalorder %v1631_v42, 0 }
 0x145   : > { %v675_v19 = vsel %vm667_vm13, %v658_v49, %v674_v17  ;;  %v678_v55 = vsel %vm668_vm14, %v664_v15, 1326507024  ;;  %v671_v22 = vsel %vm667_vm13, %v655_v7, %v670_v63  ;;  %v793_v28 = vadd.s32 %v1885_v44, %v1895_v33 }
 0x146   : > { %vm1272_vm15 = vcmp.lt.s32.totalorder %v1271_v57, 0  ;;  %v676_v38 = vsel %vm666_vm12, %v673_v11, %v675_v19  ;;  %v679_v34 = vsel %vm667_vm13, %v661_v9, %v678_v55  ;;  %v1049_v39 = vand.u32 2147483647, %v1921_v14 }
 0x147   : > { %v808_v23 = vsel %vm1272_vm15, 0, %v1271_v57  ;;  %v680_v26 = vsel %vm666_vm12, %v677_v21, %v679_v34  ;;  %v1955_v8 = vmul.u32.u64.low %v681_v51, %v676_v38  ;;  %v1956_v27 = vmul.u32.u64.high %v681_v51, %v676_v38, %v1955_v8 }
 0x148   : > { %v809_v30 = vsub.s32 32, %v808_v23  ;;  %v813_v37 = vsub.s32 4294967266, %v808_v23  ;;  %v1962_v46 = vmul.u32.u64.low %v681_v51, %v680_v26  ;;  %v1963_v41 = vmul.u32.u64.high %v681_v51, %v680_v26, %v1962_v46 }
 0x149   : > { %v1281_v60 = vadd.s32 4294967169, %v1053_v10  ;;  %v810_v53 = vshll.u32 %v1933_v47, %v808_v23  ;;  %v672_v3 = vsel %vm666_vm12, %v669_v32, %v671_v22  ;;  %vm416_vm1 = vcmp.lt.s32.totalorder %v1929_v36, 2  ;;  %v292_v10 = vpop.f32.mrf.mxu0 }
 0x14a   : > { %v811_v20 = vshrl.u32 %v793_v28, %v809_v30  ;;  %v814_v16 = vadd.s32 127, %v813_v37  ;;  %v823_v61 = vsub.s32 4, %v1923_v25  ;;  %v691_v44 = vadd.s32 1, %v1956_v27 }
 0x14b   : > { %v1059_v33 = vadd.s32 1, %v1281_v60  ;;  %vm417_vm2 = vcmp.eq.s32.totalorder %v1929_v36, 0  ;;  %vm420_vm3 = vcmp.eq.s32.totalorder %v1929_v36, 2  ;;  %v688_v4 = vmul.u32 %v681_v51, %v672_v3 }
 0x14c   : > { %v1419_v43 = vpop.eup %1418  ;;  %v812_v0 = vor.u32 %v811_v20, %v810_v53  ;;  %v815_v50 = vshll.u32 %v814_v16, 23  ;;  %vm690_vm4 = vc.u32 %v1963_v41, %v1955_v8  ;;  %v1056_v40 = vand.u32 8388607, %v1049_v39 }
 0x14d   : > { %v1421_v2 = vpop.eup %1420  ;;  %v421_v47 = vxor.u32 2147483648, %v1419_v43  ;;  %vm1060_vm5 = vcmp.gt.s32.totalorder %v1059_v33, 0  ;;  %v692_v5 = vsel %vm690_vm4, %v691_v44, %v1956_v27  ;;  %v824_v49 = vsel %vm739_vm0, %v823_v61, %v1923_v25 }
 0x14e   : > { %v418_v59 = vxor.u32 2147483648, %v1421_v2  ;;  %v816_v18 = vor.u32 4788187, %v815_v50  ;;  %v693_v9 = vadd.s32 %v692_v5, %v688_v4  ;;  %v1061_v31 = vsel %vm1060_vm5, %v1059_v33, 0 }
 0x14f   : > { %v422_v7 = vsel %vm420_vm3, %v421_v47, %v1421_v2  ;;  %v819_v62 = vcvt.s32.f32 %v812_v0  ;;  %v1063_v6 = vand.u32 31, %v1061_v31  ;;  %vm413_vm6 = vweird.f32 %v1624_v24 }
 0x150   : > { %v419_v35 = vsel %vm417_vm2, %v1419_v43, %v418_v59  ;;  %v817_v51 = vand.u32 2147483647, %v816_v18  ;;  %vm1988_vm7 = vcmp.le.f32.partialorder %v737_v45, 0.7853982  ;;  %v694_v25 = vadd.s32 536870912, %v693_v9 }
 0x151   : > { %v423_v15 = vsel %vm416_vm1, %v419_v35, %v422_v7  ;;  %v826_v17 = vsel %vm1988_vm7, 0, %v824_v49  ;;  %v1064_v32 = vsub.s32 32, %v1063_v6  ;;  %v1057_v24 = vor.u32 8388608, %v1056_v40 }
 0x152   : > { %v424_v63 = vsel %vm413_vm6, nan, %v423_v15  ;;  %v820_v11 = vmul.f32 %v819_v62, %v817_v51  ;;  %v1995_v19 = vshrl.u32 %v694_v25, 30  ;;  %v1066_v36 = vshll.u32 %v1505_v48, %v1063_v6 }
 0x153   : > { %1153 = vst [vmem:[%s1915_s20] sm:$0xff] %v424_v63  ;;  %v1999_v21 = vadd.f32 %v1609_v12, %v292_v10  ;;  %v1067_v55 = vshrl.u32 %v1506_v52, %v1064_v32  ;;  %v1069_v22 = vshll.u32 %v1506_v52, %v1063_v6  ;;  %v1070_v38 = vshrl.u32 %v1507_v54, %v1064_v32 }
 0x154   : > { %v821_v45 = vxor.u32 2147483648, %v820_v11  ;;  %v696_v34 = vshll.u32 %v1995_v19, 30  ;;  %v1072_v23 = vshll.u32 %v1507_v54, %v1063_v6  ;;  %v1073_v26 = vshrl.u32 %v1508_v56, %v1064_v32 }
 0x155   : > { %v1076_v27 = vshrl.u32 %v1509_v58, %v1064_v32  ;;  %v1062_v12 = vshrl.u32 %v1061_v31, 5  ;;  %v1068_v30 = vor.u32 %v1067_v55, %v1066_v36  ;;  %v1075_v37 = vshll.u32 %v1508_v56, %v1063_v6 }
 0x156   : > { %v822_v28 = vsel %vm739_vm0, %v821_v45, %v820_v11  ;;  %v2014_v60 = vsub.s32 %v693_v9, %v696_v34  ;;  %v1071_v53 = vor.u32 %v1070_v38, %v1069_v22  ;;  %v1074_v20 = vor.u32 %v1073_v26, %v1072_v23 }
 0x157   : > { %v825_v46 = vsel %vm1988_vm7, %v1631_v42, %v822_v28  ;;  %v1077_v16 = vor.u32 %v1076_v27, %v1075_v37  ;;  %v1078_v3 = vshll.u32 %v1509_v58, %v1063_v6  ;;  %v1079_v61 = vshrl.u32 %v1510_v1, %v1064_v32 }
 0x158   : > { %1422 = vcosq.f32 %v825_v46  ;;  %v699_v44 = vsub.s32 0, %v2014_v60  ;;  %v830_v33 = vadd.s32 3, %v826_v17  ;;  %vm1084_vm8 = vcmp.lt.s32.totalorder %v1062_v12, 4 }
 0x159   : > { %1424 = vsinq.f32 %v825_v46  ;;  %v1080_v43 = vor.u32 %v1079_v61, %v1078_v3  ;;  %v532_v0 = vand.u32 2139095040, %v1999_v21  ;;  %v1065_v2 = vshrl.u32 %v1505_v48, %v1064_v32 }
 0x15a   : > { %v1266_v50 = vmin.u32 %v699_v44, %v2014_v60  ;;  %vm1081_vm9 = vcmp.lt.s32.totalorder %v1062_v12, 1  ;;  %v1086_v47 = vsel %vm1084_vm8, %v1074_v20, 2102212464  ;;  %vm1082_vm11 = vcmp.lt.s32.totalorder %v1062_v12, 2 }
 0x15b   : > { %v1089_v4 = vsel %vm1081_vm9, %v1068_v30, %v1071_v53  ;;  %v1090_v59 = vsel %vm1084_vm8, %v1077_v16, 920167782  ;;  %v1097_v18 = vshll.u32 %v1057_v24, 8  ;;  %vm1083_vm10 = vcmp.lt.s32.totalorder %v1062_v12, 3 }
 0x15c   : > { %v701_v5 = vclz %v1266_v50  ;;  %v1085_v40 = vsel %vm1081_vm9, %v1065_v2, %v1068_v30  ;;  %v1093_v7 = vsel %vm1081_vm9, %v1071_v53, %v1074_v20  ;;  %v1087_v49 = vsel %vm1083_vm10, %v1071_v53, %v1086_v47  ;;  %v312_v30 = vpop.f32.mrf.mxu1 }
 0x15d   : > { %v1091_v9 = vsel %vm1083_vm10, %v1074_v20, %v1090_v59  ;;  %v1094_v31 = vsel %vm1084_vm8, %v1080_v43, 1326507024  ;;  %v533_v35 = vshrl.u32 %v532_v0, 23  ;;  %v831_v51 = vand.u32 3, %v830_v33  ;;  %v1442_v33 = vld [vmem:[%s2224_s2] ss:$0 sm:$0xff] }
 0x15e   : > { %v1267_v62 = vadd.s32 4294967294, %v701_v5  ;;  %v1092_v6 = vsel %vm1082_vm11, %v1089_v4, %v1091_v9  ;;  %v1095_v10 = vsel %vm1083_vm10, %v1077_v16, %v1094_v31  ;;  %v1088_v11 = vsel %vm1082_vm11, %v1085_v40, %v1087_v49 }
 0x15f   : > { %v1096_v15 = vsel %vm1082_vm11, %v1093_v7, %v1095_v10  ;;  %v2027_v57 = vmul.u32.u64.low %v1097_v18, %v1092_v6  ;;  %v2028_v25 = vmul.u32.u64.high %v1097_v18, %v1092_v6, %v2027_v57  ;;  %v1261_v63 = vadd.s32 4294967169, %v533_v35 }
 0x160   : > { %vm1268_vm12 = vcmp.lt.s32.totalorder %v1267_v62, 0  ;;  %v2032_v17 = vmul.u32.u64.low %v1097_v18, %v1096_v15  ;;  %v2033_v32 = vmul.u32.u64.high %v1097_v18, %v1096_v15, %v2032_v17  ;;  %v529_v36 = vand.u32 2147483647, %v1999_v21 }
 0x161   : > { %v704_v24 = vsel %vm1268_vm12, 0, %v1267_v62  ;;  %v539_v45 = vadd.s32 1, %v1261_v63  ;;  %vm829_vm13 = vweird.f32 %v1631_v42  ;;  %v689_v55 = vadd.s32 %v1955_v8, %v1963_v41 }
 0x162   : > { %v705_v22 = vsub.s32 32, %v704_v24  ;;  %v709_v38 = vsub.s32 4294967266, %v704_v24  ;;  %vm836_vm14 = vcmp.eq.s32.totalorder %v831_v51, 2  ;;  %v1104_v34 = vmul.u32 %v1097_v18, %v1088_v11 }
 0x163   : > { %v1107_v23 = vadd.s32 1, %v2028_v25  ;;  %vm540_vm15 = vcmp.gt.s32.totalorder %v539_v45, 0  ;;  %v706_v27 = vshll.u32 %v2014_v60, %v704_v24  ;;  %vm1106_vm0 = vc.u32 %v2033_v32, %v2027_v57 }
 0x164   : > { %v707_v28 = vshrl.u32 %v689_v55, %v705_v22  ;;  %v710_v12 = vadd.s32 127, %v709_v38  ;;  %v536_v41 = vand.u32 8388607, %v529_v36  ;;  %v541_v53 = vsel %vm540_vm15, %v539_v45, 0 }
 0x165   : > { %v1423_v26 = vpop.eup %1422  ;;  %v1108_v8 = vsel %vm1106_vm0, %v1107_v23, %v2028_v25  ;;  %vm833_vm1 = vcmp.eq.s32.totalorder %v831_v51, 0  ;;  %vm635_vm2 = vcmp.lt.s32.totalorder %v1815_v29, 0  ;;  %v543_v44 = vand.u32 31, %v541_v53 }
 0x166   : > { %v1425_v37 = vpop.eup %1424  ;;  %v837_v46 = vxor.u32 2147483648, %v1423_v26  ;;  %v708_v16 = vor.u32 %v707_v28, %v706_v27  ;;  %v711_v3 = vshll.u32 %v710_v12, 23  ;;  %v1109_v61 = vadd.s32 %v1108_v8, %v1104_v34 }
 0x167   : > { %v834_v20 = vxor.u32 2147483648, %v1425_v37  ;;  %v2051_v43 = vadd.f32 %v1442_v33, %v312_v30  ;;  %vm832_vm3 = vcmp.lt.s32.totalorder %v831_v51, 2  ;;  %vm2055_vm4 = vcmp.le.f32.partialorder %v633_v13, 0.7853982 }
 0x168   : > { %v838_v60 = vsel %vm836_vm14, %v837_v46, %v1425_v37  ;;  %v712_v2 = vor.u32 4788187, %v711_v3  ;;  %v1110_v47 = vadd.s32 536870912, %v1109_v61  ;;  %v719_v59 = vsub.s32 4, %v1995_v19 }
 0x169   : > { %v835_v0 = vsel %vm833_vm1, %v1423_v26, %v834_v20  ;;  %v537_v18 = vor.u32 8388608, %v536_v41  ;;  %v544_v5 = vsub.s32 32, %v543_v44  ;;  %v715_v49 = vcvt.s32.f32 %v708_v16 }
 0x16a   : > { %v839_v4 = vsel %vm832_vm3, %v835_v0, %v838_v60  ;;  %v713_v7 = vand.u32 2147483647, %v712_v2  ;;  %v2062_v9 = vshrl.u32 %v1110_v47, 30  ;;  %v948_v51 = vand.u32 2139095040, %v2051_v43 }
 0x16b   : > { %v840_v40 = vsel %vm829_vm13, nan, %v839_v4  ;;  %v547_v13 = vshrl.u32 %v1506_v52, %v544_v5  ;;  %v550_v31 = vshrl.u32 %v1507_v54, %v544_v5  ;;  %v553_v35 = vshrl.u32 %v1508_v56, %v544_v5 }
 0x16c   : > { %1157 = vst [vmem:[%s1915_s20 + $0x20] sm:$0xff] %v840_v40  ;;  %v716_v62 = vmul.f32 %v715_v49, %v713_v7  ;;  %v1112_v6 = vshll.u32 %v2062_v9, 30  ;;  %v546_v10 = vshll.u32 %v1505_v48, %v543_v44  ;;  %v549_v42 = vshll.u32 %v1506_v52, %v543_v44 }
 0x16d   : > { %v542_v15 = vshrl.u32 %v541_v53, 5  ;;  %v552_v25 = vshll.u32 %v1507_v54, %v543_v44  ;;  %v555_v63 = vshll.u32 %v1508_v56, %v543_v44  ;;  %v556_v11 = vshrl.u32 %v1509_v58, %v544_v5 }
 0x16e   : > { %v717_v17 = vxor.u32 2147483648, %v716_v62  ;;  %v1113_v24 = vsub.s32 %v1109_v61, %v1112_v6  ;;  %v548_v45 = vor.u32 %v547_v13, %v546_v10  ;;  %v551_v55 = vor.u32 %v550_v31, %v549_v42 }
 0x16f   : > { %v554_v22 = vor.u32 %v553_v35, %v552_v25  ;;  %v557_v38 = vor.u32 %v556_v11, %v555_v63  ;;  %v558_v34 = vshll.u32 %v1509_v58, %v543_v44  ;;  %v559_v23 = vshrl.u32 %v1510_v1, %v544_v5 }
 0x170   : > { %v718_v26 = vsel %vm635_vm2, %v717_v17, %v716_v62  ;;  %v720_v27 = vsel %vm635_vm2, %v719_v59, %v1995_v19  ;;  %v1115_v28 = vsub.s32 0, %v1113_v24  ;;  %v577_v12 = vshll.u32 %v537_v18, 8 }
 0x171   : > { %v721_v30 = vsel %vm2055_vm4, %v1815_v29, %v718_v26  ;;  %v545_v37 = vshrl.u32 %v1505_v48, %v544_v5  ;;  %v560_v46 = vor.u32 %v559_v23, %v558_v34  ;;  %v949_v8 = vshrl.u32 %v948_v51, 23 }
 0x172   : > { %1426 = vcosq.f32 %v721_v30  ;;  %v1282_v41 = vmin.u32 %v1115_v28, %v1113_v24  ;;  %vm561_vm5 = vcmp.lt.s32.totalorder %v542_v15, 1  ;;  %vm564_vm6 = vcmp.lt.s32.totalorder %v542_v15, 4 }
 0x173   : > { %1428 = vsinq.f32 %v721_v30  ;;  %v566_v53 = vsel %vm564_vm6, %v554_v22, 2102212464  ;;  %v569_v20 = vsel %vm561_vm5, %v548_v45, %v551_v55  ;;  %v570_v16 = vsel %vm564_vm6, %v557_v38, 920167782 }
 0x174   : > { %v1117_v3 = vclz %v1282_v41  ;;  %vm562_vm7 = vcmp.lt.s32.totalorder %v542_v15, 2  ;;  %vm563_vm8 = vcmp.lt.s32.totalorder %v542_v15, 3  ;;  %v565_v19 = vsel %vm561_vm5, %v545_v37, %v548_v45 }
 0x175   : > { %v567_v61 = vsel %vm563_vm8, %v551_v55, %v566_v53  ;;  %v571_v60 = vsel %vm563_vm8, %v554_v22, %v570_v16  ;;  %v573_v44 = vsel %vm561_vm5, %v551_v55, %v554_v22  ;;  %v574_v33 = vsel %vm564_vm6, %v560_v46, 1326507024 }
 0x176   : > { %v722_v0 = vsel %vm2055_vm4, 0, %v720_v27  ;;  %v1283_v2 = vadd.s32 4294967294, %v1117_v3  ;;  %v572_v47 = vsel %vm562_vm7, %v569_v20, %v571_v60  ;;  %v575_v4 = vsel %vm563_vm8, %v557_v38, %v574_v33 }
 0x177   : > { %v568_v59 = vsel %vm562_vm7, %v565_v19, %v567_v61  ;;  %v576_v18 = vsel %vm562_vm7, %v573_v44, %v575_v4  ;;  %v2088_v5 = vmul.u32.u64.low %v577_v12, %v572_v47  ;;  %v2089_v40 = vmul.u32.u64.high %v577_v12, %v572_v47, %v2088_v5 }
 0x178   : > { %vm1284_vm9 = vcmp.lt.s32.totalorder %v1283_v2, 0  ;;  %v2092_v7 = vmul.u32.u64.low %v577_v12, %v576_v18  ;;  %v2093_v49 = vmul.u32.u64.high %v577_v12, %v576_v18, %v2092_v7  ;;  %v1277_v13 = vadd.s32 4294967169, %v949_v8 }
 0x179   : > { %v726_v31 = vadd.s32 3, %v722_v0  ;;  %v1120_v35 = vsel %vm1284_vm9, 0, %v1283_v2  ;;  %v1105_v50 = vadd.s32 %v2027_v57, %v2033_v32  ;;  %v584_v10 = vmul.u32 %v577_v12, %v568_v59 }
 0x17a   : > { %v1121_v51 = vsub.s32 32, %v1120_v35  ;;  %v1125_v62 = vsub.s32 4294967266, %v1120_v35  ;;  %v955_v6 = vadd.s32 1, %v1277_v13  ;;  %v587_v42 = vadd.s32 1, %v2089_v40 }
 0x17b   : > { %v945_v15 = vand.u32 2147483647, %v2051_v43  ;;  %v1122_v25 = vshll.u32 %v1113_v24, %v1120_v35  ;;  %vm586_vm11 = vc.u32 %v2093_v49, %v2088_v5  ;;  %v727_v17 = vand.u32 3, %v726_v31 }
 0x17c   : > { %v1123_v63 = vshrl.u32 %v1105_v50, %v1121_v51  ;;  %v1126_v11 = vadd.s32 127, %v1125_v62  ;;  %v588_v45 = vsel %vm586_vm11, %v587_v42, %v2089_v40  ;;  %vm956_vm10 = vcmp.gt.s32.totalorder %v955_v6, 0 }
 0x17d   : > { %v589_v32 = vadd.s32 %v588_v45, %v584_v10  ;;  %v957_v22 = vsel %vm956_vm10, %v955_v6, 0  ;;  %vm725_vm12 = vweird.f32 %v1815_v29  ;;  %vm1051_vm13 = vcmp.lt.s32.totalorder %v1921_v14, 0 }
 0x17e   : > { %v1124_v55 = vor.u32 %v1123_v63, %v1122_v25  ;;  %v1127_v57 = vshll.u32 %v1126_v11, 23  ;;  %v1135_v24 = vsub.s32 4, %v2062_v9  ;;  %v959_v34 = vand.u32 31, %v957_v22 }
 0x17f   : > { %v1427_v38 = vpop.eup %1426  ;;  %vm2107_vm14 = vcmp.le.f32.partialorder %v1049_v39, 0.7853982  ;;  %v590_v12 = vadd.s32 536870912, %v589_v32  ;;  %v952_v30 = vand.u32 8388607, %v945_v15  ;;  %vm729_vm15 = vcmp.eq.s32.totalorder %v727_v17, 0 }
 0x180   : > { %v1429_v23 = vpop.eup %1428  ;;  %v733_v26 = vxor.u32 2147483648, %v1427_v38  ;;  %v1128_v28 = vor.u32 4788187, %v1127_v57  ;;  %vm732_vm0 = vcmp.eq.s32.totalorder %v727_v17, 2  ;;  %v960_v46 = vsub.s32 32, %v959_v34 }
 0x181   : > { %v730_v37 = vxor.u32 2147483648, %v1429_v23  ;;  %v1131_v53 = vcvt.s32.f32 %v1124_v55  ;;  %v2113_v20 = vshrl.u32 %v590_v12, 30  ;;  %vm728_vm1 = vcmp.lt.s32.totalorder %v727_v17, 2 }
 0x182   : > { %v734_v8 = vsel %vm732_vm0, %v733_v26, %v1429_v23  ;;  %v1129_v41 = vand.u32 2147483647, %v1128_v28  ;;  %v1136_v16 = vsel %vm1051_vm13, %v1135_v24, %v2062_v9  ;;  %v963_v3 = vshrl.u32 %v1506_v52, %v960_v46 }
 0x183   : > { %v731_v39 = vsel %vm729_vm15, %v1427_v38, %v730_v37  ;;  %v592_v60 = vshll.u32 %v2113_v20, 30  ;;  %v953_v44 = vor.u32 8388608, %v952_v30  ;;  %v962_v0 = vshll.u32 %v1505_v48, %v959_v34 }
 0x184   : > { %v735_v19 = vsel %vm728_vm1, %v731_v39, %v734_v8  ;;  %v1132_v61 = vmul.f32 %v1131_v53, %v1129_v41  ;;  %v966_v2 = vshrl.u32 %v1507_v54, %v960_v46  ;;  %v969_v47 = vshrl.u32 %v1508_v56, %v960_v46 }
 0x185   : > { %v736_v33 = vsel %vm725_vm12, nan, %v735_v19  ;;  %v593_v59 = vsub.s32 %v589_v32, %v592_v60  ;;  %v958_v9 = vshrl.u32 %v957_v22, 5  ;;  %v965_v18 = vshll.u32 %v1506_v52, %v959_v34 }
 0x186   : > { %1156 = vst [vmem:[%s1915_s20 + $0x18] sm:$0xff] %v736_v33  ;;  %v1133_v4 = vxor.u32 2147483648, %v1132_v61  ;;  %v964_v40 = vor.u32 %v963_v3, %v962_v0  ;;  %v968_v7 = vshll.u32 %v1507_v54, %v959_v34  ;;  %v971_v13 = vshll.u32 %v1508_v56, %v959_v34 }
 0x187   : > { %v972_v29 = vshrl.u32 %v1509_v58, %v960_v46  ;;  %v595_v35 = vsub.s32 0, %v593_v59  ;;  %v974_v50 = vshll.u32 %v1509_v58, %v959_v34  ;;  %v975_v51 = vshrl.u32 %v1510_v1, %v960_v46 }
 0x188   : > { %v1134_v31 = vsel %vm1051_vm13, %v1133_v4, %v1132_v61  ;;  %v967_v52 = vor.u32 %v966_v2, %v965_v18  ;;  %v970_v6 = vor.u32 %v969_v47, %v968_v7  ;;  %v1138_v42 = vsel %vm2107_vm14, 0, %v1136_v16 }
 0x189   : > { %v1137_v62 = vsel %vm2107_vm14, %v1921_v14, %v1134_v31  ;;  %v973_v10 = vor.u32 %v972_v29, %v971_v13  ;;  %v1262_v54 = vmin.u32 %v595_v35, %v593_v59  ;;  %v976_v56 = vor.u32 %v975_v51, %v974_v50 }
 0x18a   : > { %1430 = vcosq.f32 %v1137_v62  ;;  %v961_v25 = vshrl.u32 %v1505_v48, %v960_v46  ;;  %v993_v63 = vshll.u32 %v953_v44, 8  ;;  %vm977_vm2 = vcmp.lt.s32.totalorder %v958_v9, 1 }
 0x18b   : > { %1432 = vsinq.f32 %v1137_v62  ;;  %v597_v58 = vclz %v1262_v54  ;;  %vm979_vm3 = vcmp.lt.s32.totalorder %v958_v9, 3  ;;  %vm980_vm4 = vcmp.lt.s32.totalorder %v958_v9, 4 }
 0x18c   : > { %v982_v1 = vsel %vm980_vm4, %v970_v6, 2102212464  ;;  %v985_v11 = vsel %vm977_vm2, %v964_v40, %v967_v52  ;;  %v986_v17 = vsel %vm980_vm4, %v973_v10, 920167782  ;;  %v989_v45 = vsel %vm977_vm2, %v967_v52, %v970_v6 }
 0x18d   : > { %v1263_v55 = vadd.s32 4294967294, %v597_v58  ;;  %vm978_vm5 = vcmp.lt.s32.totalorder %v958_v9, 2  ;;  %v987_v57 = vsel %vm979_vm3, %v970_v6, %v986_v17  ;;  %v990_v32 = vsel %vm980_vm4, %v976_v56, 1326507024 }
 0x18e   : > { %v981_v22 = vsel %vm977_vm2, %v961_v25, %v964_v40  ;;  %v983_v38 = vsel %vm979_vm3, %v967_v52, %v982_v1  ;;  %v988_v24 = vsel %vm978_vm5, %v985_v11, %v987_v57  ;;  %v991_v34 = vsel %vm979_vm3, %v973_v10, %v990_v32 }
 0x18f   : > { %vm1264_vm6 = vcmp.lt.s32.totalorder %v1263_v55, 0  ;;  %v992_v48 = vsel %vm978_vm5, %v989_v45, %v991_v34  ;;  %v2142_v23 = vmul.u32.u64.low %v993_v63, %v988_v24  ;;  %v2143_v26 = vmul.u32.u64.high %v993_v63, %v988_v24, %v2142_v23 }
 0x190   : > { %v1142_v27 = vadd.s32 3, %v1138_v42  ;;  %v600_v28 = vsel %vm1264_vm6, 0, %v1263_v55  ;;  %v2145_v12 = vmul.u32.u64.low %v993_v63, %v992_v48  ;;  %v2146_v30 = vmul.u32.u64.high %v993_v63, %v992_v48, %v2145_v12 }
 0x191   : > { %v585_v37 = vadd.s32 %v2088_v5, %v2093_v49  ;;  %v601_v46 = vsub.s32 32, %v600_v28  ;;  %v605_v8 = vsub.s32 4294967266, %v600_v28  ;;  %v984_v41 = vsel %vm978_vm5, %v981_v22, %v983_v38 }
 0x192   : > { %v602_v53 = vshll.u32 %v593_v59, %v600_v28  ;;  %v1003_v3 = vadd.s32 1, %v2143_v26  ;;  %v1143_v19 = vand.u32 3, %v1142_v27  ;;  %v1000_v61 = vmul.u32 %v993_v63, %v984_v41 }
 0x193   : > { %v603_v39 = vshrl.u32 %v585_v37, %v601_v46  ;;  %v606_v16 = vadd.s32 127, %v605_v8  ;;  %vm1002_vm7 = vc.u32 %v2146_v30, %v2142_v23  ;;  %vm1141_vm10 = vweird.f32 %v1921_v14 }
 0x194   : > { %v1004_v33 = vsel %vm1002_vm7, %v1003_v3, %v2143_v26  ;;  %vm1148_vm8 = vcmp.eq.s32.totalorder %v1143_v19, 2  ;;  %vm1145_vm9 = vcmp.eq.s32.totalorder %v1143_v19, 0  ;;  %vm1144_vm11 = vcmp.lt.s32.totalorder %v1143_v19, 2 }
 0x195   : > { %v604_v60 = vor.u32 %v603_v39, %v602_v53  ;;  %v607_v44 = vshll.u32 %v606_v16, 23  ;;  %v1005_v2 = vadd.s32 %v1004_v33, %v1000_v61  ;;  %vm531_vm12 = vcmp.lt.s32.totalorder %v1999_v21, 0 }
 0x196   : > { %v615_v62 = vsub.s32 4, %v2113_v20  ;;  %vm530_vm13 = vcmp.le.f32.partialorder %v529_v36, 0.7853982  ;;  %v1001_v11 = vadd.s32 %v2142_v23, %v2146_v30  ;;  %vm621_vm2 = vweird.f32 %v1999_v21 }
 0x197   : > { %v1431_v0 = vpop.eup %1430  ;;  %v608_v47 = vor.u32 4788187, %v607_v44  ;;  %v1006_v59 = vadd.s32 536870912, %v1005_v2  ;;  %v611_v40 = vcvt.s32.f32 %v604_v60  ;;  %vm947_vm3 = vcmp.lt.s32.totalorder %v2051_v43, 0 }
 0x198   : > { %v1433_v5 = vpop.eup %1432  ;;  %v1149_v49 = vxor.u32 2147483648, %v1431_v0  ;;  %v616_v14 = vsel %vm531_vm12, %v615_v62, %v2113_v20  ;;  %vm946_vm4 = vcmp.le.f32.partialorder %v945_v15, 0.7853982 }
 0x199   : > { %v1146_v4 = vxor.u32 2147483648, %v1433_v5  ;;  %v609_v18 = vand.u32 2147483647, %v608_v47  ;;  %v1007_v13 = vshrl.u32 %v1006_v59, 30  ;;  %v618_v25 = vsel %vm530_vm13, 0, %v616_v14 }
 0x19a   : > { %v1150_v9 = vsel %vm1148_vm8, %v1149_v49, %v1433_v5  ;;  %v622_v58 = vadd.s32 3, %v618_v25  ;;  %vm1037_vm8 = vweird.f32 %v2051_v43 }
 0x19b   : > { %v1147_v7 = vsel %vm1145_vm9, %v1431_v0, %v1146_v4  ;;  %v612_v31 = vmul.f32 %v611_v40, %v609_v18  ;;  %v1008_v50 = vshll.u32 %v1007_v13, 30  ;;  %v1031_v41 = vsub.s32 4, %v1007_v13 }
 0x19c   : > { %v1151_v29 = vsel %vm1144_vm11, %v1147_v7, %v1150_v9  ;;  %v623_v36 = vand.u32 3, %v622_v58 }
 0x19d   : > { %v1152_v35 = vsel %vm1141_vm10, nan, %v1151_v29  ;;  %v613_v51 = vxor.u32 2147483648, %v612_v31  ;;  %v1009_v52 = vsub.s32 %v1005_v2, %v1008_v50  ;;  %v1032_v16 = vsel %vm947_vm3, %v1031_v41, %v1007_v13 }
 0x19e   : > { %1160 = vst [vmem:[%s1915_s20 + $0x38] sm:$0xff] %v1152_v35  ;;  %vm628_vm15 = vcmp.eq.s32.totalorder %v623_v36, 2  ;;  %vm625_vm0 = vcmp.eq.s32.totalorder %v623_v36, 0  ;;  %vm624_vm1 = vcmp.lt.s32.totalorder %v623_v36, 2 }
 0x19f   : > { %v614_v6 = vsel %vm531_vm12, %v613_v51, %v612_v31  ;;  %v1011_v54 = vsub.s32 0, %v1009_v52 }
 0x1a0   : > { %v617_v10 = vsel %vm530_vm13, %v1999_v21, %v614_v6  ;;  %v1034_v21 = vsel %vm946_vm4, 0, %v1032_v16 }
 0x1a1   : > { %1434 = vcosq.f32 %v617_v10  ;;  %v1278_v56 = vmin.u32 %v1011_v54, %v1009_v52  ;;  %v1038_v3 = vadd.s32 3, %v1034_v21 }
 0x1a2   : > { %1436 = vsinq.f32 %v617_v10 }
 0x1a3   : > { %v1013_v42 = vclz %v1278_v56  ;;  %v1039_v19 = vand.u32 3, %v1038_v3 }
 0x1a5   : > { %v1279_v63 = vadd.s32 4294967294, %v1013_v42  ;;  %vm1044_vm5 = vcmp.eq.s32.totalorder %v1039_v19, 2  ;;  %vm1041_vm6 = vcmp.eq.s32.totalorder %v1039_v19, 0  ;;  %vm1040_vm7 = vcmp.lt.s32.totalorder %v1039_v19, 2 }
 0x1a7   : > { %vm1280_vm14 = vcmp.lt.s32.totalorder %v1279_v63, 0 }
 0x1a8   : > { %v1016_v1 = vsel %vm1280_vm14, 0, %v1279_v63 }
 0x1a9   : > { %v1017_v17 = vsub.s32 32, %v1016_v1  ;;  %v1021_v45 = vsub.s32 4294967266, %v1016_v1  ;;  %v1018_v55 = vshll.u32 %v1009_v52, %v1016_v1 }
 0x1ab   : > { %v1019_v57 = vshrl.u32 %v1001_v11, %v1017_v17  ;;  %v1022_v32 = vadd.s32 127, %v1021_v45 }
 0x1ad   : > { %v1020_v38 = vor.u32 %v1019_v57, %v1018_v55  ;;  %v1023_v24 = vshll.u32 %v1022_v32, 23 }
 0x1ae   : > { %v1435_v22 = vpop.eup %1434 }
 0x1af   : > { %v1437_v20 = vpop.eup %1436  ;;  %v629_v34 = vxor.u32 2147483648, %v1435_v22  ;;  %v1024_v26 = vor.u32 4788187, %v1023_v24  ;;  %v1027_v12 = vcvt.s32.f32 %v1020_v38 }
 0x1b0   : > { %v626_v48 = vxor.u32 2147483648, %v1437_v20 }
 0x1b1   : > { %v630_v27 = vsel %vm628_vm15, %v629_v34, %v1437_v20  ;;  %v1025_v23 = vand.u32 2147483647, %v1024_v26 }
 0x1b2   : > { %v627_v28 = vsel %vm625_vm0, %v1435_v22, %v626_v48 }
 0x1b3   : > { %v631_v30 = vsel %vm624_vm1, %v627_v28, %v630_v27  ;;  %v1028_v46 = vmul.f32 %v1027_v12, %v1025_v23 }
 0x1b4   : > { %v632_v37 = vsel %vm621_vm2, nan, %v631_v30 }
 0x1b5   : > { %1155 = vst [vmem:[%s1915_s20 + $0x10] sm:$0xff] %v632_v37  ;;  %v1029_v8 = vxor.u32 2147483648, %v1028_v46 }
 0x1b7   : > { %v1030_v53 = vsel %vm947_vm3, %v1029_v8, %v1028_v46 }
 0x1b8   : > { %v1033_v39 = vsel %vm946_vm4, %v2051_v43, %v1030_v53 }
 0x1b9   : > { %1438 = vcosq.f32 %v1033_v39 }
 0x1ba   : > { %1440 = vsinq.f32 %v1033_v39 }
 0x1c6   : > { %v1439_v61 = vpop.eup %1438 }
 0x1c7   : > { %v1441_v60 = vpop.eup %1440  ;;  %v1045_v44 = vxor.u32 2147483648, %v1439_v61 }
 0x1c8   : > { %v1042_v33 = vxor.u32 2147483648, %v1441_v60 }
 0x1c9   : > { %v1046_v15 = vsel %vm1044_vm5, %v1045_v44, %v1441_v60 }
 0x1ca   : > { %v1043_v0 = vsel %vm1041_vm6, %v1439_v61, %v1042_v33 }
 0x1cb   : > { %v1047_v2 = vsel %vm1040_vm7, %v1043_v0, %v1046_v15 }
 0x1cc   : > { %v1048_v5 = vsel %vm1037_vm8, nan, %v1047_v2 }
 0x1cd   : > { %1159 = vst [vmem:[%s1915_s20 + $0x30] sm:$0xff] %v1048_v5 }
 0x1ce   : > { %1456 = shalt.err (!%p1453_p3)
}
 0x1cf   : > { %s1457_s8 = scalar_lea.hbm %s2174_s30, 1024  ;;  %s1461_s11 = scalar_lea.hbm %s2225_s3, 4096 }
 0x1d0   : > { %p1458_p4 = scmp.ne.s32.totalorder %s2174_s30, %s1457_s8  ;;  %p1462_p9 = scmp.lt.s32.totalorder %s2174_s30, %s2225_s3 }
 0x1d1   : > { %p1463_p10 = scmp.lt.s32.totalorder %s1461_s11, %s1457_s8 }
 0x1d2   : > { %p1459_p7 = pnand %p1458_p4, %p1572_p5 }
 0x1d3   : > { %p1464_p11 = por %p1463_p10, %p1462_p9 }
 0x1d4   : > { %p1460_p8 = pneg %p1459_p7 }
 0x1d6   : > { %p1465_p12 = pnand %p1464_p11, %p1460_p8 }
 0x1d8   : > { %1468 = shalt.err (!%p1465_p12)
}
 0x1d9   : > { %s1512_s20 = smov 128   ;;  %s1513_s24 = smov 8  }
 0x1da   : > { %1363 = dma.vmem_to_hbm [thread:$0]  (%p1572_p5), %s2176_s27, 1024, %s2174_s30, %s2182_s16, %s1512_s20, %s1512_s20, %s1513_s24  }
 0x1db PF: > { %p1369_p13 = scmp.ge.s32.totalorder %s1503_s15, 2  ;;  %s1190_s25 = sand.u32 1, %s1491_s12  }
 0x1dc   : > { %s1191_s26 = scalar_lea.sflag [#allocation3], %s1190_s25 }
 0x1dd   : > { %p1366_p0 = pnand %p1369_p13, %p1576_p6 }
 0x1df   : > { %p1367_p1 = pneg %p1366_p0 }
 0x1e1   : > { %1486 = dma.done.wait (%p1367_p1), %s1191_s26, 1024  }
 0x1e2   : > { %1488 = vsyncadd (%p1367_p1), %s1191_s26, 4294966272  ;;  %p13_p2 = scmp.ge.s32.totalorder %s1559_s18, 6   ;;  %s2240_s12 = smov %s1495_s13 }
 0x1e3   : > { %s2241_s13 = smov %s1499_s14  ;;  %s2242_s14 = smov %s1570_s21 }
 0x1e4   : > { %s2243_s15 = smov %s1559_s18  ;;  %15 = sbr.rel (!%p13_p2) target bundleno = 3 (0x3), region = 67 }
 0x1e9   :  { %1196 = vsyncpa [#allocation3], 1 }
 0x1ea   :  { %1198 = vsyncpa [#allocation3 + $0x1], 1 }

</bundles_post_ra>
